<compile_context>
chip_gen: v7x
topology: tpu7x:2x2x1
jax: 0.10.0
libtpu: 0.0.40
codegen_flags: <defaults>
</compile_context>

<pallas_src>
import jax
import jax.numpy as jnp
from jax.experimental import pallas as pl
from jax.experimental.pallas import tpu as pltpu


_UNROLL = 8


def _round_up(x, m):
    return ((x + m - 1) // m) * m


# ----------------------------- Pallas kernel --------------------------------

def _emit_row_gather(ids_ref, table_ref, out_ref, sem, base, n_rows, unroll):
    """Issue `n_rows` (1, E_pad) row-gather DMAs table -> out tile, then one bulk wait.

    `n_rows` / `unroll` are static Python ints; `base` is the first flattened
    token index of this tile (traced scalar).  `table_ref` may live in HBM
    (pl.ANY) or VMEM (resident fast path) -- the DMA path is identical.
    """

    def issue(r):
        tok = ids_ref[base + r]
        pltpu.make_async_copy(
            table_ref.at[pl.ds(tok, 1), :],   # (1, E_pad) source row
            out_ref.at[pl.ds(r, 1), :],       # (1, E_pad) destination row
            sem.at[0],
        ).start()

    main = (n_rows // unroll) * unroll
    if main > 0:
        @pl.loop(0, main // unroll)
        def _(blk):
            r0 = pl.multiple_of(blk * unroll, unroll)
            for u in range(unroll):           # static partial unroll
                issue(r0 + u)
    for r in range(main, n_rows):             # static tail (< unroll rows)
        issue(r)

    # Single bulk wait: every copy above signals sem.at[0] with the same byte
    # count (E_pad * 4), so one wait on an (n_rows, E_pad) view retires the
    # whole tile (n_rows * E_pad * 4 bytes) in a single semaphore op.
    tile = out_ref.at[pl.ds(0, n_rows), :]
    pltpu.make_async_copy(tile, tile, sem.at[0]).wait()


def _make_token_embedding_kernel(rows, rem, unroll):
    """rows: rows per full tile; rem: valid rows in the last tile (1..rows)."""

    def kernel(ids_ref, table_ref, out_ref, sem):
        base = pl.program_id(0) * rows
        if rem == rows:
            # N divides evenly into tiles: single static path.
            _emit_row_gather(ids_ref, table_ref, out_ref, sem, base, rows, unroll)
        else:
            last = pl.num_programs(0) - 1

            @pl.when(pl.program_id(0) != last)
            def _():
                _emit_row_gather(ids_ref, table_ref, out_ref, sem, base, rows, unroll)

            @pl.when(pl.program_id(0) == last)
            def _():
                # Only the valid rows: no wasted gathers for padded rows.
                _emit_row_gather(ids_ref, table_ref, out_ref, sem, base, rem, unroll)

    return kernel


# ------------------------------ wrapper --------------------------------------

def _vmem_capacity_bytes(default_bytes=64 * 1024 * 1024):
    # Default to 64 MiB == v7x per-TensorCore VMEM (most restrictive part).
    try:
        cap = getattr(pltpu.get_tpu_info(), "vmem_capacity_bytes", None)
        if cap:
            return int(cap)
    except Exception:
        pass
    return default_bytes


def token_embedding(token_ids, table, *, rows_per_tile=256, table_in_vmem=None):
    """token_ids: [B, S] int ids, table: [V, E] float -> [B, S, E]."""
    B, S = token_ids.shape
    V, E = table.shape
    N = B * S

    # Lane-dense rows: pad E up to a multiple of 128 (>= 512 B per f32 row).
    E_pad = _round_up(E, 128)
    if E_pad != E:
        table = jnp.pad(table, ((0, 0), (0, E_pad - E)))

    itemsize = jnp.dtype(table.dtype).itemsize
    cap = _vmem_capacity_bytes()
    table_bytes = V * E_pad * itemsize

    # VMEM-resident-table fast path (auto): budget 2x for double buffering.
    if table_in_vmem is None:
        table_in_vmem = (2 * table_bytes) <= cap // 4

    # Row-tile sizing against this generation's VMEM: the output block is
    # double-buffered -> 2 * rows * E_pad * itemsize, plus the resident table.
    rows = max(8, min(int(rows_per_tile), _round_up(N, 8)))
    rows = _round_up(rows, 8)
    resident_bytes = 2 * table_bytes if table_in_vmem else 0
    vmem_budget = cap // 2
    while rows > 8 and (2 * rows * E_pad * itemsize + resident_bytes) > vmem_budget:
        rows = max(8, _round_up(rows // 2, 8))

    num_tiles = -(-N // rows)             # cdiv
    n_pad = num_tiles * rows
    rem = N - (num_tiles - 1) * rows      # valid rows in the last tile (1..rows)

    # Flat int32 ids, clamped so a bad id can never drive an out-of-bounds DMA.
    # (nn.Embedding would raise on out-of-range ids; valid ids are unaffected.)
    ids = jnp.clip(token_ids.reshape(N).astype(jnp.int32), 0, V - 1)

    if table_in_vmem:
        # Constant block index -> fetched into VMEM once, resident thereafter.
        table_spec = pl.BlockSpec((V, E_pad), lambda t, ids_ref: (0, 0))
    else:
        # Table stays in HBM; no auto-DMA, gather rows directly from HBM.
        table_spec = pl.BlockSpec(memory_space=pl.ANY)

    vmem_needed = 2 * rows * E_pad * itemsize + resident_bytes
    vmem_limit = int(min(cap, max(32 * 1024 * 1024, vmem_needed + 16 * 1024 * 1024)))

    kernel = _make_token_embedding_kernel(rows, rem, min(_UNROLL, rows))

    out_flat = pl.pallas_call(
        kernel,
        out_shape=jax.ShapeDtypeStruct((n_pad, E_pad), table.dtype),
        grid_spec=pltpu.PrefetchScalarGridSpec(
            num_scalar_prefetch=1,                      # ids -> SMEM
            grid=(num_tiles,),
            in_specs=[table_spec],
            out_specs=pl.BlockSpec((rows, E_pad), lambda t, ids_ref: (t, 0)),
            scratch_shapes=[pltpu.SemaphoreType.DMA((1,))],
        ),
        compiler_params=pltpu.CompilerParams(
            dimension_semantics=("parallel",),          # shard tiles across TCs
            vmem_limit_bytes=vmem_limit,
        ),
    )(ids, table)

    return out_flat[:N, :E].reshape(B, S, E)


# --------------------------------- main ---------------------------------------

if __name__ == "__main__":
    B, S = 2, 8
    VOCAB, EMBED = 64, 32

    key = jax.random.PRNGKey(0)
    k_ids, k_tab = jax.random.split(key)

    token_ids = jax.random.randint(k_ids, (B, S), 0, VOCAB, dtype=jnp.int32)
    # nn.Embedding default init: weight ~ N(0, 1).
    table = jax.random.normal(k_tab, (VOCAB, EMBED), dtype=jnp.float32)

    ref = jnp.take(table, token_ids, axis=0)

    # Default config: small table -> VMEM-resident fast path, single tile.
    out = jax.block_until_ready(token_embedding(token_ids, table))
    assert out.shape == (B, S, EMBED)
    assert jnp.allclose(out, ref, atol=1e-6, rtol=1e-6)

    # HBM-table path with a multi-tile grid and a partial last tile
    # (exercises the last-tile guard and the bulk wait on `rem` rows).
    ids_small = token_ids[:, :5]
    out2 = jax.block_until_ready(
        token_embedding(ids_small, table, rows_per_tile=8, table_in_vmem=False))
    assert out2.shape == (B, 5, EMBED)
    assert jnp.allclose(out2, jnp.take(table, ids_small, axis=0), atol=1e-6, rtol=1e-6)

    print("KERNEL_OK")
</pallas_src>

<mosaic_0001>
module attributes {stable_mosaic.version = 11 : i64} {
  func.func @kernel(%arg0: i32, %arg1: memref<16xi32, #tpu.memory_space<smem>>, %arg2: memref<64x128xf32, #tpu.memory_space<vmem>>, %arg3: memref<16x128xf32, #tpu.memory_space<vmem>>, %arg4: memref<1x!tpu.dma_semaphore, #tpu.memory_space<semaphore_mem>>) attributes {dimension_semantics = [#tpu.dimension_semantics<parallel>], iteration_bounds = array<i64: 1>, scalar_prefetch = 1 : i64, scratch_operands = 1 : i64, tpu.core_type = #tpu.core_type<tc>, window_params = [{pipeline_mode = #tpu.pipeline_mode<synchronous>, transform_indices = @transform_0, window_bounds = array<i64: 64, 128>}, {transform_indices = @transform_1, window_bounds = array<i64: 16, 128>}]} {
    %c16_i32 = arith.constant 16 : i32
    %0 = arith.muli %arg0, %c16_i32 : i32
    %c0_i32 = arith.constant 0 : i32
    %c2_i32 = arith.constant 2 : i32
    %1 = arith.addi %c0_i32, %c2_i32 : i32
    %c1_i32 = arith.constant 1 : i32
    scf.for %arg5 = %c0_i32 to %1 step %c1_i32  : i32 {
      %c1_i32_6 = arith.constant 1 : i32
      %6 = arith.muli %arg5, %c1_i32_6 : i32
      %c0_i32_7 = arith.constant 0 : i32
      %7 = arith.addi %c0_i32_7, %6 : i32
      %c8_i32 = arith.constant 8 : i32
      %8 = arith.muli %7, %c8_i32 : i32
      %9 = tpu.assume_multiple %8, 8 : i32
      %c0_i32_8 = arith.constant 0 : i32
      %10 = arith.addi %9, %c0_i32_8 : i32
      %11 = arith.addi %0, %10 : i32
      %12 = arith.index_cast %11 : i32 to index
      %13 = memref.load %arg1[%12] : memref<16xi32, #tpu.memory_space<smem>>
      %c0_i32_9 = arith.constant 0 : i32
      %c0_i32_10 = arith.constant 0 : i32
      %14 = tpu.memref_slice %arg2[%13, %c0_i32_10] : memref<64x128xf32, #tpu.memory_space<vmem>> -> memref<1x128xf32, #tpu.memory_space<vmem>>
      %c0_i32_11 = arith.constant 0 : i32
      %15 = tpu.memref_slice %arg3[%10, %c0_i32_11] : memref<16x128xf32, #tpu.memory_space<vmem>> -> memref<1x128xf32, #tpu.memory_space<vmem>>
      %16 = tpu.memref_slice %arg4[%c0_i32_9] : memref<1x!tpu.dma_semaphore, #tpu.memory_space<semaphore_mem>> -> memref<1x!tpu.dma_semaphore, #tpu.memory_space<semaphore_mem>>
      %17 = tpu.memref_squeeze %16 : memref<1x!tpu.dma_semaphore, #tpu.memory_space<semaphore_mem>> -> memref<!tpu.dma_semaphore, #tpu.memory_space<semaphore_mem>>
      tpu.enqueue_dma source(%14 : memref<1x128xf32, #tpu.memory_space<vmem>>) target(%15 : memref<1x128xf32, #tpu.memory_space<vmem>>) target_semaphore(%17 : memref<!tpu.dma_semaphore, #tpu.memory_space<semaphore_mem>>)
      %c1_i32_12 = arith.constant 1 : i32
      %18 = arith.addi %9, %c1_i32_12 : i32
      %19 = arith.addi %0, %18 : i32
      %20 = arith.index_cast %19 : i32 to index
      %21 = memref.load %arg1[%20] : memref<16xi32, #tpu.memory_space<smem>>
      %c0_i32_13 = arith.constant 0 : i32
      %c0_i32_14 = arith.constant 0 : i32
      %22 = tpu.memref_slice %arg2[%21, %c0_i32_14] : memref<64x128xf32, #tpu.memory_space<vmem>> -> memref<1x128xf32, #tpu.memory_space<vmem>>
      %c0_i32_15 = arith.constant 0 : i32
      %23 = tpu.memref_slice %arg3[%18, %c0_i32_15] : memref<16x128xf32, #tpu.memory_space<vmem>> -> memref<1x128xf32, #tpu.memory_space<vmem>>
      %24 = tpu.memref_slice %arg4[%c0_i32_13] : memref<1x!tpu.dma_semaphore, #tpu.memory_space<semaphore_mem>> -> memref<1x!tpu.dma_semaphore, #tpu.memory_space<semaphore_mem>>
      %25 = tpu.memref_squeeze %24 : memref<1x!tpu.dma_semaphore, #tpu.memory_space<semaphore_mem>> -> memref<!tpu.dma_semaphore, #tpu.memory_space<semaphore_mem>>
      tpu.enqueue_dma source(%22 : memref<1x128xf32, #tpu.memory_space<vmem>>) target(%23 : memref<1x128xf32, #tpu.memory_space<vmem>>) target_semaphore(%25 : memref<!tpu.dma_semaphore, #tpu.memory_space<semaphore_mem>>)
      %c2_i32_16 = arith.constant 2 : i32
      %26 = arith.addi %9, %c2_i32_16 : i32
      %27 = arith.addi %0, %26 : i32
      %28 = arith.index_cast %27 : i32 to index
      %29 = memref.load %arg1[%28] : memref<16xi32, #tpu.memory_space<smem>>
      %c0_i32_17 = arith.constant 0 : i32
      %c0_i32_18 = arith.constant 0 : i32
      %30 = tpu.memref_slice %arg2[%29, %c0_i32_18] : memref<64x128xf32, #tpu.memory_space<vmem>> -> memref<1x128xf32, #tpu.memory_space<vmem>>
      %c0_i32_19 = arith.constant 0 : i32
      %31 = tpu.memref_slice %arg3[%26, %c0_i32_19] : memref<16x128xf32, #tpu.memory_space<vmem>> -> memref<1x128xf32, #tpu.memory_space<vmem>>
      %32 = tpu.memref_slice %arg4[%c0_i32_17] : memref<1x!tpu.dma_semaphore, #tpu.memory_space<semaphore_mem>> -> memref<1x!tpu.dma_semaphore, #tpu.memory_space<semaphore_mem>>
      %33 = tpu.memref_squeeze %32 : memref<1x!tpu.dma_semaphore, #tpu.memory_space<semaphore_mem>> -> memref<!tpu.dma_semaphore, #tpu.memory_space<semaphore_mem>>
      tpu.enqueue_dma source(%30 : memref<1x128xf32, #tpu.memory_space<vmem>>) target(%31 : memref<1x128xf32, #tpu.memory_space<vmem>>) target_semaphore(%33 : memref<!tpu.dma_semaphore, #tpu.memory_space<semaphore_mem>>)
      %c3_i32 = arith.constant 3 : i32
      %34 = arith.addi %9, %c3_i32 : i32
      %35 = arith.addi %0, %34 : i32
      %36 = arith.index_cast %35 : i32 to index
      %37 = memref.load %arg1[%36] : memref<16xi32, #tpu.memory_space<smem>>
      %c0_i32_20 = arith.constant 0 : i32
      %c0_i32_21 = arith.constant 0 : i32
      %38 = tpu.memref_slice %arg2[%37, %c0_i32_21] : memref<64x128xf32, #tpu.memory_space<vmem>> -> memref<1x128xf32, #tpu.memory_space<vmem>>
      %c0_i32_22 = arith.constant 0 : i32
      %39 = tpu.memref_slice %arg3[%34, %c0_i32_22] : memref<16x128xf32, #tpu.memory_space<vmem>> -> memref<1x128xf32, #tpu.memory_space<vmem>>
      %40 = tpu.memref_slice %arg4[%c0_i32_20] : memref<1x!tpu.dma_semaphore, #tpu.memory_space<semaphore_mem>> -> memref<1x!tpu.dma_semaphore, #tpu.memory_space<semaphore_mem>>
      %41 = tpu.memref_squeeze %40 : memref<1x!tpu.dma_semaphore, #tpu.memory_space<semaphore_mem>> -> memref<!tpu.dma_semaphore, #tpu.memory_space<semaphore_mem>>
      tpu.enqueue_dma source(%38 : memref<1x128xf32, #tpu.memory_space<vmem>>) target(%39 : memref<1x128xf32, #tpu.memory_space<vmem>>) target_semaphore(%41 : memref<!tpu.dma_semaphore, #tpu.memory_space<semaphore_mem>>)
      %c4_i32 = arith.constant 4 : i32
      %42 = arith.addi %9, %c4_i32 : i32
      %43 = arith.addi %0, %42 : i32
      %44 = arith.index_cast %43 : i32 to index
      %45 = memref.load %arg1[%44] : memref<16xi32, #tpu.memory_space<smem>>
      %c0_i32_23 = arith.constant 0 : i32
      %c0_i32_24 = arith.constant 0 : i32
      %46 = tpu.memref_slice %arg2[%45, %c0_i32_24] : memref<64x128xf32, #tpu.memory_space<vmem>> -> memref<1x128xf32, #tpu.memory_space<vmem>>
      %c0_i32_25 = arith.constant 0 : i32
      %47 = tpu.memref_slice %arg3[%42, %c0_i32_25] : memref<16x128xf32, #tpu.memory_space<vmem>> -> memref<1x128xf32, #tpu.memory_space<vmem>>
      %48 = tpu.memref_slice %arg4[%c0_i32_23] : memref<1x!tpu.dma_semaphore, #tpu.memory_space<semaphore_mem>> -> memref<1x!tpu.dma_semaphore, #tpu.memory_space<semaphore_mem>>
      %49 = tpu.memref_squeeze %48 : memref<1x!tpu.dma_semaphore, #tpu.memory_space<semaphore_mem>> -> memref<!tpu.dma_semaphore, #tpu.memory_space<semaphore_mem>>
      tpu.enqueue_dma source(%46 : memref<1x128xf32, #tpu.memory_space<vmem>>) target(%47 : memref<1x128xf32, #tpu.memory_space<vmem>>) target_semaphore(%49 : memref<!tpu.dma_semaphore, #tpu.memory_space<semaphore_mem>>)
      %c5_i32 = arith.constant 5 : i32
      %50 = arith.addi %9, %c5_i32 : i32
      %51 = arith.addi %0, %50 : i32
      %52 = arith.index_cast %51 : i32 to index
      %53 = memref.load %arg1[%52] : memref<16xi32, #tpu.memory_space<smem>>
      %c0_i32_26 = arith.constant 0 : i32
      %c0_i32_27 = arith.constant 0 : i32
      %54 = tpu.memref_slice %arg2[%53, %c0_i32_27] : memref<64x128xf32, #tpu.memory_space<vmem>> -> memref<1x128xf32, #tpu.memory_space<vmem>>
      %c0_i32_28 = arith.constant 0 : i32
      %55 = tpu.memref_slice %arg3[%50, %c0_i32_28] : memref<16x128xf32, #tpu.memory_space<vmem>> -> memref<1x128xf32, #tpu.memory_space<vmem>>
      %56 = tpu.memref_slice %arg4[%c0_i32_26] : memref<1x!tpu.dma_semaphore, #tpu.memory_space<semaphore_mem>> -> memref<1x!tpu.dma_semaphore, #tpu.memory_space<semaphore_mem>>
      %57 = tpu.memref_squeeze %56 : memref<1x!tpu.dma_semaphore, #tpu.memory_space<semaphore_mem>> -> memref<!tpu.dma_semaphore, #tpu.memory_space<semaphore_mem>>
      tpu.enqueue_dma source(%54 : memref<1x128xf32, #tpu.memory_space<vmem>>) target(%55 : memref<1x128xf32, #tpu.memory_space<vmem>>) target_semaphore(%57 : memref<!tpu.dma_semaphore, #tpu.memory_space<semaphore_mem>>)
      %c6_i32 = arith.constant 6 : i32
      %58 = arith.addi %9, %c6_i32 : i32
      %59 = arith.addi %0, %58 : i32
      %60 = arith.index_cast %59 : i32 to index
      %61 = memref.load %arg1[%60] : memref<16xi32, #tpu.memory_space<smem>>
      %c0_i32_29 = arith.constant 0 : i32
      %c0_i32_30 = arith.constant 0 : i32
      %62 = tpu.memref_slice %arg2[%61, %c0_i32_30] : memref<64x128xf32, #tpu.memory_space<vmem>> -> memref<1x128xf32, #tpu.memory_space<vmem>>
      %c0_i32_31 = arith.constant 0 : i32
      %63 = tpu.memref_slice %arg3[%58, %c0_i32_31] : memref<16x128xf32, #tpu.memory_space<vmem>> -> memref<1x128xf32, #tpu.memory_space<vmem>>
      %64 = tpu.memref_slice %arg4[%c0_i32_29] : memref<1x!tpu.dma_semaphore, #tpu.memory_space<semaphore_mem>> -> memref<1x!tpu.dma_semaphore, #tpu.memory_space<semaphore_mem>>
      %65 = tpu.memref_squeeze %64 : memref<1x!tpu.dma_semaphore, #tpu.memory_space<semaphore_mem>> -> memref<!tpu.dma_semaphore, #tpu.memory_space<semaphore_mem>>
      tpu.enqueue_dma source(%62 : memref<1x128xf32, #tpu.memory_space<vmem>>) target(%63 : memref<1x128xf32, #tpu.memory_space<vmem>>) target_semaphore(%65 : memref<!tpu.dma_semaphore, #tpu.memory_space<semaphore_mem>>)
      %c7_i32 = arith.constant 7 : i32
      %66 = arith.addi %9, %c7_i32 : i32
      %67 = arith.addi %0, %66 : i32
      %68 = arith.index_cast %67 : i32 to index
      %69 = memref.load %arg1[%68] : memref<16xi32, #tpu.memory_space<smem>>
      %c0_i32_32 = arith.constant 0 : i32
      %c0_i32_33 = arith.constant 0 : i32
      %70 = tpu.memref_slice %arg2[%69, %c0_i32_33] : memref<64x128xf32, #tpu.memory_space<vmem>> -> memref<1x128xf32, #tpu.memory_space<vmem>>
      %c0_i32_34 = arith.constant 0 : i32
      %71 = tpu.memref_slice %arg3[%66, %c0_i32_34] : memref<16x128xf32, #tpu.memory_space<vmem>> -> memref<1x128xf32, #tpu.memory_space<vmem>>
      %72 = tpu.memref_slice %arg4[%c0_i32_32] : memref<1x!tpu.dma_semaphore, #tpu.memory_space<semaphore_mem>> -> memref<1x!tpu.dma_semaphore, #tpu.memory_space<semaphore_mem>>
      %73 = tpu.memref_squeeze %72 : memref<1x!tpu.dma_semaphore, #tpu.memory_space<semaphore_mem>> -> memref<!tpu.dma_semaphore, #tpu.memory_space<semaphore_mem>>
      tpu.enqueue_dma source(%70 : memref<1x128xf32, #tpu.memory_space<vmem>>) target(%71 : memref<1x128xf32, #tpu.memory_space<vmem>>) target_semaphore(%73 : memref<!tpu.dma_semaphore, #tpu.memory_space<semaphore_mem>>)
    }
    %c2_i32_0 = arith.constant 2 : i32
    %c0_i32_1 = arith.constant 0 : i32
    %c0_i32_2 = arith.constant 0 : i32
    %c0_i32_3 = arith.constant 0 : i32
    %2 = tpu.memref_slice %arg3[%c0_i32_2, %c0_i32_3] : memref<16x128xf32, #tpu.memory_space<vmem>> -> memref<16x128xf32, #tpu.memory_space<vmem>>
    %c0_i32_4 = arith.constant 0 : i32
    %c0_i32_5 = arith.constant 0 : i32
    %3 = tpu.memref_slice %arg3[%c0_i32_4, %c0_i32_5] : memref<16x128xf32, #tpu.memory_space<vmem>> -> memref<16x128xf32, #tpu.memory_space<vmem>>
    %4 = tpu.memref_slice %arg4[%c0_i32_1] : memref<1x!tpu.dma_semaphore, #tpu.memory_space<semaphore_mem>> -> memref<1x!tpu.dma_semaphore, #tpu.memory_space<semaphore_mem>>
    %5 = tpu.memref_squeeze %4 : memref<1x!tpu.dma_semaphore, #tpu.memory_space<semaphore_mem>> -> memref<!tpu.dma_semaphore, #tpu.memory_space<semaphore_mem>>
    tpu.wait_dma2 semaphore(%5 : memref<!tpu.dma_semaphore, #tpu.memory_space<semaphore_mem>>) src(%2 : memref<16x128xf32, #tpu.memory_space<vmem>>) dst(%3 : memref<16x128xf32, #tpu.memory_space<vmem>>)
    return
  }
  func.func @transform_0(%arg0: i32, %arg1: memref<16xi32, #tpu.memory_space<smem>>) -> (i32, i32) {
    %c0_i32 = arith.constant 0 : i32
    %c0_i32_0 = arith.constant 0 : i32
    %c0_i32_1 = arith.constant 0 : i32
    return %c0_i32, %c0_i32_0 : i32, i32
  }
  func.func @transform_1(%arg0: i32, %arg1: memref<16xi32, #tpu.memory_space<smem>>) -> (i32, i32) {
    %c0_i32 = arith.constant 0 : i32
    %c0_i32_0 = arith.constant 0 : i32
    return %arg0, %c0_i32 : i32, i32
  }
}

</mosaic_0001>

<bundles_post_ra>
// kernel: tpu_custom_call.1
= control target key start
LH: loop header
LB: loop body
LE: loop exit
PB: predicated region body
PF: predicated region fallthrough
CT: control target
= control target key end

     0   :  { %s774_s0 = inlined_call_operand.hbm [shape: s32[16], index: 0, kind: input, shape index: {}]   ;;  %s775_s1 = inlined_call_operand.hbm [shape: f32[64,128], index: 1, kind: input, shape index: {}]   ;;  %s776_s2 = inlined_call_operand.hbm [shape: f32[16,128], index: 2, kind: output, shape index: {}]  }
   0x1   :  { %s612_s11 = scalar_lea.hbm %s774_s0, 16 }
   0x2   :  { %p613_p0 = scmp.ne.s32.totalorder %s774_s0, %s612_s11  ;;  %p616_p1 = scmp.lt.u32.totalorder %s612_s11, %s774_s0 }
   0x4   :  { %p618_p2 = pnand %p616_p1, %p613_p0 }
   0x6   :  { %621 = shalt.err (!%p618_p2)  }
   0x7   :  { %s682_s16 = smov [#allocation4]  }
   0x8   :  { %8 = dma.hbm_to_smem %s774_s0, 16, %s682_s16, [#allocation3] }
   0x9   :  { %670 = dma.done.wait [#allocation3], 16 }
   0xa   :  { %671 = vsyncadd [#allocation3], 4294967280 }
   0xb   :  { %10 = sfence }
   0xc   :  { %11 = vsyncpa [#allocation6], 0 }
   0xd   :  { %12 = vsyncpa [#allocation7], 0  ;;  %s683_s19 = smov [#allocation5]   ;;  %s622_s23 = scalar_lea.hbm %s775_s1, 1024 }
   0xe   :  { %s18_s20 = sshll.u32 %s683_s19, 4  ;;  %p623_p3 = scmp.ne.s32.totalorder %s775_s1, %s622_s23  ;;  %s19_s20 = int_to_ptr.vmem [resolvable:$true] %s18_s20 }
   0xf   :  { %p626_p4 = scmp.lt.u32.totalorder %s622_s23, %s775_s1 }
  0x11   :  { %p628_p5 = pnand %p626_p4, %p623_p3 }
  0x13   :  { %631 = shalt.err (!%p628_p5)
}
  0x14   :  { %s632_s0 = scalar_lea.vmem %s19_s20, 1024  ;;  %p637_p7 = scmp.lt.s32.totalorder %s19_s20, %s19_s20 }
  0x15   :  { %p633_p6 = scmp.ne.s32.totalorder %s19_s20, %s632_s0  ;;  %p638_p8 = scmp.lt.s32.totalorder %s632_s0, %s632_s0 }
  0x17   :  { %p639_p9 = por %p638_p8, %p637_p7 }
  0x19   :  { %p640_p10 = pnand %p639_p9, %p633_p6 }
  0x1b   :  { %643 = shalt.err (!%p640_p10)
}
  0x1c   :  { %s684_s28 = smov 128   ;;  %s685_s29 = smov 8  }
  0x1d   :  { %24 = dma.hbm_to_vmem [thread:$0]  %s775_s1, 1024, %s19_s20, [#allocation6], %s684_s28, %s684_s28, %s685_s29  }
  0x1e   :  { %672 = dma.done.wait [#allocation6], 1024  }
  0x1f   :  { %673 = vsyncadd [#allocation6], 4294966272  ;;  %s729_s4 = smov 0  }
  0x20 LB: > { %s735_s5 = sshll.u32 %s680_s4, 3  ;;  %s680_s4 = sphi %s729_s4, %s34_s4  }
  0x21   : > { %s37_s6 = sld [smem:[#allocation4 + %s735_s5]]  ;;  %s739_s8 = scalar_lea.vmem [#allocation8], %s735_s5 }
  0x27   : > { %s38_s7 = scalar_lea.vmem [#allocation5], %s37_s6 }
  0x28   : > { %v57_v0 = vld [vmem:[%s38_s7] sm:$0x1] }
  0x29   : > { %58 = vst [vmem:[%s739_s8] sm:$0x1] %v57_v0 }
  0x2a   : > { %83 = vsyncadd [#allocation2], 16  ;;  %s84_s1 = sadd.s32 1, %s735_s5 }
  0x2b   : > { %s86_s9 = sld [smem:[#allocation4 + %s84_s1]] }
  0x31   : > { %s87_s10 = scalar_lea.vmem [#allocation5], %s86_s9 }
  0x32   : > { %v106_v1 = vld [vmem:[%s87_s10] sm:$0x1] }
  0x33   : > { %579 = vst [vmem:[%s739_s8 + $0x1] sm:$0x1] %v106_v1 }
  0x34   : > { %132 = vsyncadd [#allocation2], 16  ;;  %s133_s11 = sadd.s32 2, %s735_s5 }
  0x35   : > { %s135_s12 = sld [smem:[#allocation4 + %s133_s11]] }
  0x3b   : > { %s136_s13 = scalar_lea.vmem [#allocation5], %s135_s12 }
  0x3c   : > { %v155_v2 = vld [vmem:[%s136_s13] sm:$0x1] }
  0x3d   : > { %582 = vst [vmem:[%s739_s8 + $0x2] sm:$0x1] %v155_v2 }
  0x3e   : > { %181 = vsyncadd [#allocation2], 16  ;;  %s182_s14 = sadd.s32 3, %s735_s5 }
  0x3f   : > { %s184_s15 = sld [smem:[#allocation4 + %s182_s14]] }
  0x45   : > { %s185_s16 = scalar_lea.vmem [#allocation5], %s184_s15 }
  0x46   : > { %v204_v3 = vld [vmem:[%s185_s16] sm:$0x1] }
  0x47   : > { %585 = vst [vmem:[%s739_s8 + $0x3] sm:$0x1] %v204_v3 }
  0x48   : > { %230 = vsyncadd [#allocation2], 16  ;;  %s231_s17 = sadd.s32 4, %s735_s5 }
  0x49   : > { %s233_s18 = sld [smem:[#allocation4 + %s231_s17]] }
  0x4f   : > { %s234_s19 = scalar_lea.vmem [#allocation5], %s233_s18 }
  0x50   : > { %v253_v4 = vld [vmem:[%s234_s19] sm:$0x1] }
  0x51   : > { %588 = vst [vmem:[%s739_s8 + $0x4] sm:$0x1] %v253_v4 }
  0x52   : > { %279 = vsyncadd [#allocation2], 16  ;;  %s280_s20 = sadd.s32 5, %s735_s5 }
  0x53   : > { %s282_s21 = sld [smem:[#allocation4 + %s280_s20]] }
  0x59   : > { %s283_s22 = scalar_lea.vmem [#allocation5], %s282_s21 }
  0x5a   : > { %v302_v5 = vld [vmem:[%s283_s22] sm:$0x1] }
  0x5b   : > { %591 = vst [vmem:[%s739_s8 + $0x5] sm:$0x1] %v302_v5 }
  0x5c   : > { %328 = vsyncadd [#allocation2], 16  ;;  %s329_s23 = sadd.s32 6, %s735_s5 }
  0x5d   : > { %s331_s24 = sld [smem:[#allocation4 + %s329_s23]] }
  0x63   : > { %s332_s25 = scalar_lea.vmem [#allocation5], %s331_s24 }
  0x64   : > { %v351_v6 = vld [vmem:[%s332_s25] sm:$0x1] }
  0x65   : > { %594 = vst [vmem:[%s739_s8 + $0x6] sm:$0x1] %v351_v6 }
  0x66   : > { %377 = vsyncadd [#allocation2], 16  ;;  %s378_s26 = sadd.s32 7, %s735_s5 }
  0x67   : > { %s380_s27 = sld [smem:[#allocation4 + %s378_s26]] }
  0x6d   : > { %s381_s0 = scalar_lea.vmem [#allocation5], %s380_s27 }
  0x6e   : > { %v400_v7 = vld [vmem:[%s381_s0] sm:$0x1] }
  0x6f   : > { %597 = vst [vmem:[%s739_s8 + $0x7] sm:$0x1] %v400_v7 }
  0x70   : > { %426 = vsyncadd [#allocation2], 16  ;;  %s34_s4 = sadd.s32 1, %s680_s4  }
  0x71   : > { %p31_p11 = scmp.ge.s32.totalorder %s34_s4, 2  }
  0x73   :  { %33 = sbr.rel (!%p31_p11) target bundleno = 32 (0x20), region = 371 }
  0x7a   :  { %674 = dma.done.wait [#allocation2], 256 }
  0x7b   :  { %675 = vsyncadd [#allocation2], 4294967040  ;;  %s686_s30 = smov [#allocation8]  }
  0x7c   :  { %s435_s3 = sshll.u32 %s686_s30, 4  ;;  %s436_s3 = int_to_ptr.vmem [resolvable:$true] %s435_s3 }
  0x7d   :  { %s644_s6 = scalar_lea.vmem %s436_s3, 256  ;;  %p649_p13 = scmp.lt.s32.totalorder %s436_s3, %s436_s3 }
  0x7e   :  { %p645_p12 = scmp.ne.s32.totalorder %s436_s3, %s644_s6  ;;  %p650_p0 = scmp.lt.s32.totalorder %s644_s6, %s644_s6 }
  0x80   :  { %p651_p1 = por %p650_p0, %p649_p13 }
  0x82   :  { %p652_p2 = pnand %p651_p1, %p645_p12 }
  0x84   :  { %655 = shalt.err (!%p652_p2)
}
  0x85   :  { %s656_s8 = scalar_lea.hbm %s776_s2, 256 }
  0x86   :  { %p657_p3 = scmp.ne.s32.totalorder %s776_s2, %s656_s8  ;;  %p660_p4 = scmp.lt.u32.totalorder %s656_s8, %s776_s2 }
  0x88   :  { %p662_p5 = pnand %p660_p4, %p657_p3 }
  0x8a   :  { %665 = shalt.err (!%p662_p5)
}
  0x8b   :  { %441 = dma.vmem_to_hbm [thread:$0]  %s436_s3, 256, %s776_s2, [#allocation7], %s684_s28, %s684_s28, %s685_s29  }
  0x8c   :  { %676 = dma.done.wait [#allocation7], 256  }
  0x8d   :  { %677 = vsyncadd [#allocation7], 4294967040 }
  0x8e   :  { %445 = vsyncpa [#allocation6], 1 }
  0x8f   :  { %446 = vsyncpa [#allocation7], 1 }
  0x90   :  { %447 = vsyncmov [#allocation2] }
  0x93   :  { %s448_s13 = vpop.sfrf %447 }
  0x94   :  { %p598_p6 = scmp.ne.s32.totalorder %s448_s13, 0 }
  0x96   :  { %452 = shalt.err (%p598_p6)  }

</bundles_post_ra>
